<compile_context>
chip_gen: v7x
topology: tpu7x:2x2x1
jax: 0.10.0
libtpu: 0.0.40
codegen_flags: <defaults>
</compile_context>

<pallas_src>
import functools

import jax
import jax.numpy as jnp
from jax import lax
from jax.experimental import pallas as pl
from jax.experimental.pallas import tpu as pltpu


def _stem_kernel(me_ref, oe_ref, mo_ref, oo_ref, w_ref, scale_ref, bias_ref,
                 o_ref, *, TPH, PW, C):
    # me_ref / mo_ref : (1, 2*TPH*PW, K) bf16  im2col patches of the 2*TPH conv
    #                   rows of this pool-row group (even / odd conv columns).
    # oe_ref / oo_ref : (1, PW, K)       bf16  the overlap conv row above the
    #                   group (duplicate of conv row 0 for the first group).
    # w_ref           : (K, C)           bf16  flattened 7x7x3 weights, C = 128.
    # scale_ref/bias_ref : (1, C) f32    folded BatchNorm (eval mode).
    # o_ref           : (1, TPH, PW, C)  f32   pooled output rows of this group.
    w = w_ref[...]
    scale = scale_ref[...]
    bias = bias_ref[...]

    def conv_bn_relu(p):                       # (M, K) bf16 -> (M, C) f32
        acc = jnp.dot(p, w, preferred_element_type=jnp.float32)
        return jnp.maximum(acc * scale + bias, 0.0)

    R = 2 * TPH
    ye = conv_bn_relu(me_ref[0]).reshape(R, PW, C)   # even conv cols
    yo = conv_bn_relu(mo_ref[0]).reshape(R, PW, C)   # odd  conv cols
    ve = conv_bn_relu(oe_ref[0])                     # (PW, C) overlap row
    vo = conv_bn_relu(oo_ref[0])

    row0 = lax.broadcasted_iota(jnp.int32, (PW, 1), 0) == 0

    for t in range(TPH):                             # static (trace-time) loop
        # vertical 3-window over conv rows 2t-1, 2t, 2t+1 (group-local indices)
        if t == 0:
            pe = jnp.maximum(jnp.maximum(ve, ye[0]), ye[1])
            po = jnp.maximum(jnp.maximum(vo, yo[0]), yo[1])
        else:
            pe = jnp.maximum(jnp.maximum(ye[2 * t - 1], ye[2 * t]), ye[2 * t + 1])
            po = jnp.maximum(jnp.maximum(yo[2 * t - 1], yo[2 * t]), yo[2 * t + 1])
        # horizontal 3-window stride 2: pool col q = max(o[q-1], e[q], o[q]);
        # the pad at q=0 is replaced by o[0], which is already in the window.
        eo = jnp.maximum(pe, po)
        o_prev = pltpu.roll(po, shift=1, axis=0)     # row i <- po[i-1]  (XLU)
        o_prev = jnp.where(row0, po[:1], o_prev)
        o_ref[0, t] = jnp.maximum(eo, o_prev)        # direct lane-dense store


def thermal_module_forward(x_nchw, w_oihw, gamma, beta, running_mean,
                           running_var, eps=1e-5, tile_pool_rows=8):
    N, Cin, H, W = x_nchw.shape
    Cout, _, KH, KW = w_oihw.shape
    assert H % 4 == 0, "stem expects H divisible by 4"
    assert W % 32 == 0, "stem expects W % 32 == 0 (sublane-aligned pool width)"
    OH, OW = H // 2, W // 2                 # conv1: k7, s2, p3
    PH, PW = OH // 2, OW // 2               # maxpool: k3, s2, p1
    K = KH * KW * Cin                       # im2col contraction depth (147)
    C = ((Cout + 127) // 128) * 128         # lane-dense channel dim (128)

    TPH = max(1, min(tile_pool_rows, PH))   # pool rows per grid step
    NG = pl.cdiv(PH, TPH)                   # pool-row groups (tail may be partial)

    # NCHW -> NHWC; bf16 inputs/weights (f32 accumulation inside the kernel).
    x = jnp.transpose(x_nchw, (0, 2, 3, 1)).astype(jnp.bfloat16)
    w = jnp.transpose(w_oihw, (2, 3, 1, 0)).astype(jnp.bfloat16)   # HWIO

    # Fold BatchNorm (eval mode, running stats) into per-channel scale / bias.
    scale = (gamma / jnp.sqrt(running_var + eps)).astype(jnp.float32)
    bias = (beta - running_mean * scale).astype(jnp.float32)
    scale_p = jnp.zeros((1, C), jnp.float32).at[0, :Cout].set(scale)
    bias_p = jnp.zeros((1, C), jnp.float32).at[0, :Cout].set(bias)
    w_mat = jnp.pad(w.reshape(K, Cout), ((0, 0), (0, C - Cout)))

    # ---- im2col: single HBM materialization ---------------------------------
    # Each 7x7 tap is sliced with step-4 starts so even / odd conv columns land
    # in two tensors directly; no post-hoc reorder / row-dup / stack passes.
    xpad = jnp.pad(x, ((0, 0), (3, 3), (3, 3), (0, 0)))

    def gather(parity):
        taps = []
        for kh in range(KH):
            for kw in range(KW):
                c0 = kw + 2 * parity
                taps.append(xpad[:, kh:kh + 2 * (OH - 1) + 1:2,
                                 c0:c0 + 4 * (PW - 1) + 1:4, :])
        return jnp.concatenate(taps, axis=-1).reshape(N, OH * PW, K)

    evens = gather(0)                       # conv cols 0,2,4,...  (N, OH*PW, K)
    odds = gather(1)                        # conv cols 1,3,5,...  (N, OH*PW, K)

    # Explicit VMEM budget: double-buffered blocks + resident consts + f32
    # temporaries (matters on v5e's 16 MiB default once TPH is large).
    blk_in = 2 * (2 * TPH * PW * K + PW * K) * 2           # both parities, bf16
    blk_out = TPH * PW * C * 4
    consts = K * C * 2 + 2 * C * 4
    temps = (2 * TPH + 1) * PW * C * 4 * 4                  # y/acc slack
    vmem_limit = int(min(max(2 * (blk_in + blk_out + consts) + temps + (2 << 20),
                             16 << 20), 40 << 20))

    kernel = functools.partial(_stem_kernel, TPH=TPH, PW=PW, C=C)
    main_spec = pl.BlockSpec((1, 2 * TPH * PW, K), lambda n, g: (n, g, 0))
    ovl_spec = pl.BlockSpec(
        (1, PW, K), lambda n, g: (n, jnp.maximum(2 * TPH * g - 1, 0), 0))

    z = pl.pallas_call(
        kernel,
        out_shape=jax.ShapeDtypeStruct((N, PH, PW, C), jnp.float32),
        grid=(N, NG),
        in_specs=[
            main_spec,                                      # evens: group rows
            ovl_spec,                                       # evens: overlap row
            main_spec,                                      # odds:  group rows
            ovl_spec,                                       # odds:  overlap row
            pl.BlockSpec((K, C), lambda n, g: (0, 0)),
            pl.BlockSpec((1, C), lambda n, g: (0, 0)),
            pl.BlockSpec((1, C), lambda n, g: (0, 0)),
        ],
        out_specs=pl.BlockSpec((1, TPH, PW, C), lambda n, g: (n, g, 0, 0)),
        compiler_params=pltpu.CompilerParams(
            dimension_semantics=("parallel", "parallel"),
            vmem_limit_bytes=vmem_limit),
    )(evens, evens, odds, odds, w_mat, scale_p, bias_p)

    z = z[..., :Cout]                       # drop channel padding (fuses w/ transpose under jit)
    return jnp.transpose(z, (0, 3, 1, 2))   # NHWC -> NCHW


def reference_forward(x_nchw, w_oihw, gamma, beta, mean, var, eps=1e-5):
    # Same bf16 input/weight rounding as the kernel; f32 math otherwise.
    x = jnp.transpose(x_nchw, (0, 2, 3, 1)).astype(jnp.bfloat16).astype(jnp.float32)
    w = jnp.transpose(w_oihw, (2, 3, 1, 0)).astype(jnp.bfloat16).astype(jnp.float32)
    y = lax.conv_general_dilated(x, w, (2, 2), ((3, 3), (3, 3)),
                                 dimension_numbers=('NHWC', 'HWIO', 'NHWC'),
                                 precision=lax.Precision.HIGHEST)
    scale = gamma / jnp.sqrt(var + eps)
    bias = beta - mean * scale
    y = jnp.maximum(y * scale + bias, 0.0)
    z = lax.reduce_window(y, -jnp.inf, lax.max, (1, 3, 3, 1), (1, 2, 2, 1),
                          ((0, 0), (1, 1), (1, 1), (0, 0)))
    return jnp.transpose(z, (0, 3, 1, 2))


if __name__ == "__main__":
    # thermal_module forward only uses the ResNet-50 stem:
    #   conv1: Conv2d(3, 64, k=7, s=2, p=3, bias=False)
    #   bn1:   BatchNorm2d(64) (eval mode / running stats)
    #   relu, maxpool: MaxPool2d(k=3, s=2, p=1)
    # TODO(synk): pretrained ResNet-50 checkpoint weights are not loadable here;
    # parameters are initialized deterministically instead.
    key = jax.random.PRNGKey(0)
    k1, k2, k3, k4, k5, k6 = jax.random.split(key, 6)

    N, Cin, H, W = 2, 3, 32, 32
    Cout, KH, KW = 64, 7, 7

    x = jax.random.normal(k1, (N, Cin, H, W), jnp.float32)              # NCHW
    w = jax.random.normal(k2, (Cout, Cin, KH, KW), jnp.float32) * 0.05  # OIHW
    gamma = 1.0 + 0.1 * jax.random.normal(k3, (Cout,), jnp.float32)
    beta = 0.1 * jax.random.normal(k4, (Cout,), jnp.float32)
    running_mean = 0.1 * jax.random.normal(k5, (Cout,), jnp.float32)
    running_var = jnp.abs(jax.random.normal(k6, (Cout,), jnp.float32)) + 0.5

    fwd = jax.jit(thermal_module_forward)
    out = jax.block_until_ready(fwd(x, w, gamma, beta, running_mean, running_var))

    ref = reference_forward(x, w, gamma, beta, running_mean, running_var)
    assert out.shape == (N, Cout, H // 4, W // 4), out.shape
    err = float(jnp.max(jnp.abs(out - ref)))
    assert err < 2e-3, err

    print("KERNEL_OK")
</pallas_src>

<mosaic_0001>
module attributes {stable_mosaic.version = 11 : i64} {
  func.func @_stem_kernel(%arg0: i32, %arg1: i32, %arg2: memref<1x128x147xbf16, #tpu.memory_space<vmem>>, %arg3: memref<1x8x147xbf16, #tpu.memory_space<vmem>>, %arg4: memref<1x128x147xbf16, #tpu.memory_space<vmem>>, %arg5: memref<1x8x147xbf16, #tpu.memory_space<vmem>>, %arg6: memref<147x128xbf16, #tpu.memory_space<vmem>>, %arg7: memref<1x128xf32, #tpu.memory_space<vmem>>, %arg8: memref<1x128xf32, #tpu.memory_space<vmem>>, %arg9: memref<1x8x8x128xf32, #tpu.memory_space<vmem>>) attributes {dimension_semantics = [#tpu.dimension_semantics<parallel>, #tpu.dimension_semantics<parallel>], iteration_bounds = array<i64: 2, 1>, scalar_prefetch = 0 : i64, scratch_operands = 0 : i64, tpu.core_type = #tpu.core_type<tc>, window_params = [{transform_indices = @transform_0, window_bounds = array<i64: 1, 128, 147>}, {transform_indices = @transform_1, window_bounds = array<i64: 1, 8, 147>}, {transform_indices = @transform_2, window_bounds = array<i64: 1, 128, 147>}, {transform_indices = @transform_3, window_bounds = array<i64: 1, 8, 147>}, {pipeline_mode = #tpu.pipeline_mode<synchronous>, transform_indices = @transform_4, window_bounds = array<i64: 147, 128>}, {pipeline_mode = #tpu.pipeline_mode<synchronous>, transform_indices = @transform_5, window_bounds = array<i64: 1, 128>}, {pipeline_mode = #tpu.pipeline_mode<synchronous>, transform_indices = @transform_6, window_bounds = array<i64: 1, 128>}, {transform_indices = @transform_7, window_bounds = array<i64: 1, 8, 8, 128>}]} {
    %c0 = arith.constant 0 : index
    %c0_0 = arith.constant 0 : index
    %0 = vector.load %arg6[%c0, %c0_0] : memref<147x128xbf16, #tpu.memory_space<vmem>>, vector<147x128xbf16>
    %c0_1 = arith.constant 0 : index
    %c0_2 = arith.constant 0 : index
    %1 = vector.load %arg7[%c0_1, %c0_2] : memref<1x128xf32, #tpu.memory_space<vmem>>, vector<1x128xf32>
    %c0_3 = arith.constant 0 : index
    %c0_4 = arith.constant 0 : index
    %2 = vector.load %arg8[%c0_3, %c0_4] : memref<1x128xf32, #tpu.memory_space<vmem>>, vector<1x128xf32>
    %c0_5 = arith.constant 0 : index
    %c0_6 = arith.constant 0 : index
    %c0_7 = arith.constant 0 : index
    %3 = vector.load %arg2[%c0_5, %c0_6, %c0_7] : memref<1x128x147xbf16, #tpu.memory_space<vmem>>, vector<1x128x147xbf16>
    %4 = vector.shape_cast %3 : vector<1x128x147xbf16> to vector<128x147xbf16>
    %cst = arith.constant dense<0.000000e+00> : vector<128x128xf32>
    %5 = tpu.matmul %4, %0, %cst {dimension_numbers = #tpu.dot_dimension_numbers<[1], [0], [0], [1], [0, 0, 1, 1], [], []>} : vector<128x147xbf16>, vector<147x128xbf16>, vector<128x128xf32> -> vector<128x128xf32>
    %6 = vector.broadcast %1 : vector<1x128xf32> to vector<128x128xf32>
    %7 = arith.mulf %5, %6 : vector<128x128xf32>
    %8 = vector.broadcast %2 : vector<1x128xf32> to vector<128x128xf32>
    %9 = arith.addf %7, %8 : vector<128x128xf32>
    %cst_8 = arith.constant 0.000000e+00 : f32
    %10 = vector.broadcast %cst_8 : f32 to vector<128x128xf32>
    %11 = arith.maximumf %9, %10 : vector<128x128xf32>
    %12 = vector.shape_cast %11 : vector<128x128xf32> to vector<16x8x128xf32>
    %c0_9 = arith.constant 0 : index
    %c0_10 = arith.constant 0 : index
    %c0_11 = arith.constant 0 : index
    %13 = vector.load %arg4[%c0_9, %c0_10, %c0_11] : memref<1x128x147xbf16, #tpu.memory_space<vmem>>, vector<1x128x147xbf16>
    %14 = vector.shape_cast %13 : vector<1x128x147xbf16> to vector<128x147xbf16>
    %cst_12 = arith.constant dense<0.000000e+00> : vector<128x128xf32>
    %15 = tpu.matmul %14, %0, %cst_12 {dimension_numbers = #tpu.dot_dimension_numbers<[1], [0], [0], [1], [0, 0, 1, 1], [], []>} : vector<128x147xbf16>, vector<147x128xbf16>, vector<128x128xf32> -> vector<128x128xf32>
    %16 = vector.broadcast %1 : vector<1x128xf32> to vector<128x128xf32>
    %17 = arith.mulf %15, %16 : vector<128x128xf32>
    %18 = vector.broadcast %2 : vector<1x128xf32> to vector<128x128xf32>
    %19 = arith.addf %17, %18 : vector<128x128xf32>
    %cst_13 = arith.constant 0.000000e+00 : f32
    %20 = vector.broadcast %cst_13 : f32 to vector<128x128xf32>
    %21 = arith.maximumf %19, %20 : vector<128x128xf32>
    %22 = vector.shape_cast %21 : vector<128x128xf32> to vector<16x8x128xf32>
    %c0_14 = arith.constant 0 : index
    %c0_15 = arith.constant 0 : index
    %c0_16 = arith.constant 0 : index
    %23 = vector.load %arg3[%c0_14, %c0_15, %c0_16] : memref<1x8x147xbf16, #tpu.memory_space<vmem>>, vector<1x8x147xbf16>
    %24 = vector.shape_cast %23 : vector<1x8x147xbf16> to vector<8x147xbf16>
    %cst_17 = arith.constant dense<0.000000e+00> : vector<8x128xf32>
    %25 = tpu.matmul %24, %0, %cst_17 {dimension_numbers = #tpu.dot_dimension_numbers<[1], [0], [0], [1], [0, 0, 1, 1], [], []>} : vector<8x147xbf16>, vector<147x128xbf16>, vector<8x128xf32> -> vector<8x128xf32>
    %26 = vector.broadcast %1 : vector<1x128xf32> to vector<8x128xf32>
    %27 = arith.mulf %25, %26 : vector<8x128xf32>
    %28 = vector.broadcast %2 : vector<1x128xf32> to vector<8x128xf32>
    %29 = arith.addf %27, %28 : vector<8x128xf32>
    %cst_18 = arith.constant 0.000000e+00 : f32
    %30 = vector.broadcast %cst_18 : f32 to vector<8x128xf32>
    %31 = arith.maximumf %29, %30 : vector<8x128xf32>
    %c0_19 = arith.constant 0 : index
    %c0_20 = arith.constant 0 : index
    %c0_21 = arith.constant 0 : index
    %32 = vector.load %arg5[%c0_19, %c0_20, %c0_21] : memref<1x8x147xbf16, #tpu.memory_space<vmem>>, vector<1x8x147xbf16>
    %33 = vector.shape_cast %32 : vector<1x8x147xbf16> to vector<8x147xbf16>
    %cst_22 = arith.constant dense<0.000000e+00> : vector<8x128xf32>
    %34 = tpu.matmul %33, %0, %cst_22 {dimension_numbers = #tpu.dot_dimension_numbers<[1], [0], [0], [1], [0, 0, 1, 1], [], []>} : vector<8x147xbf16>, vector<147x128xbf16>, vector<8x128xf32> -> vector<8x128xf32>
    %35 = vector.broadcast %1 : vector<1x128xf32> to vector<8x128xf32>
    %36 = arith.mulf %34, %35 : vector<8x128xf32>
    %37 = vector.broadcast %2 : vector<1x128xf32> to vector<8x128xf32>
    %38 = arith.addf %36, %37 : vector<8x128xf32>
    %cst_23 = arith.constant 0.000000e+00 : f32
    %39 = vector.broadcast %cst_23 : f32 to vector<8x128xf32>
    %40 = arith.maximumf %38, %39 : vector<8x128xf32>
    %41 = tpu.iota {dimensions = array<i32: 0>} : vector<8x1xi32>
    %c0_i32 = arith.constant 0 : i32
    %42 = vector.broadcast %c0_i32 : i32 to vector<8x1xi32>
    %43 = arith.cmpi eq, %41, %42 : vector<8x1xi32>
    %44 = vector.extract_strided_slice %12 {offsets = [0, 0, 0], sizes = [1, 8, 128], strides = [1, 1, 1]} : vector<16x8x128xf32> to vector<1x8x128xf32>
    %45 = vector.shape_cast %44 : vector<1x8x128xf32> to vector<8x128xf32>
    %46 = arith.maximumf %31, %45 : vector<8x128xf32>
    %47 = vector.extract_strided_slice %12 {offsets = [1, 0, 0], sizes = [1, 8, 128], strides = [1, 1, 1]} : vector<16x8x128xf32> to vector<1x8x128xf32>
    %48 = vector.shape_cast %47 : vector<1x8x128xf32> to vector<8x128xf32>
    %49 = arith.maximumf %46, %48 : vector<8x128xf32>
    %50 = vector.extract_strided_slice %22 {offsets = [0, 0, 0], sizes = [1, 8, 128], strides = [1, 1, 1]} : vector<16x8x128xf32> to vector<1x8x128xf32>
    %51 = vector.shape_cast %50 : vector<1x8x128xf32> to vector<8x128xf32>
    %52 = arith.maximumf %40, %51 : vector<8x128xf32>
    %53 = vector.extract_strided_slice %22 {offsets = [1, 0, 0], sizes = [1, 8, 128], strides = [1, 1, 1]} : vector<16x8x128xf32> to vector<1x8x128xf32>
    %54 = vector.shape_cast %53 : vector<1x8x128xf32> to vector<8x128xf32>
    %55 = arith.maximumf %52, %54 : vector<8x128xf32>
    %56 = arith.maximumf %49, %55 : vector<8x128xf32>
    %c1_i32 = arith.constant 1 : i32
    %57 = tpu.dynamic_rotate %55 by %c1_i32 dim 0 : vector<8x128xf32>, i32 -> vector<8x128xf32>
    %58 = vector.extract_strided_slice %55 {offsets = [0, 0], sizes = [1, 128], strides = [1, 1]} : vector<8x128xf32> to vector<1x128xf32>
    %59 = vector.shape_cast %43 : vector<8x1xi1> to vector<8x1xi1>
    %60 = vector.broadcast %59 : vector<8x1xi1> to vector<8x128xi1>
    %61 = vector.shape_cast %58 : vector<1x128xf32> to vector<1x128xf32>
    %62 = vector.broadcast %61 : vector<1x128xf32> to vector<8x128xf32>
    %63 = arith.select %60, %62, %57 : vector<8x128xi1>, vector<8x128xf32>
    %64 = arith.maximumf %56, %63 : vector<8x128xf32>
    %c0_24 = arith.constant 0 : index
    %c0_25 = arith.constant 0 : index
    %c0_26 = arith.constant 0 : index
    %c0_27 = arith.constant 0 : index
    %65 = vector.load %arg9[%c0_24, %c0_25, %c0_26, %c0_27] : memref<1x8x8x128xf32, #tpu.memory_space<vmem>>, vector<1x1x8x128xf32>
    %66 = vector.shape_cast %65 : vector<1x1x8x128xf32> to vector<8x128xf32>
    %67 = vector.shape_cast %64 : vector<8x128xf32> to vector<1x1x8x128xf32>
    tpu.vector_store %arg9[%c0_24, %c0_25, %c0_26, %c0_27], %67 {strides = array<i32>} : memref<1x8x8x128xf32, #tpu.memory_space<vmem>>, vector<1x1x8x128xf32>,
    %68 = vector.extract_strided_slice %12 {offsets = [1, 0, 0], sizes = [1, 8, 128], strides = [1, 1, 1]} : vector<16x8x128xf32> to vector<1x8x128xf32>
    %69 = vector.shape_cast %68 : vector<1x8x128xf32> to vector<8x128xf32>
    %70 = vector.extract_strided_slice %12 {offsets = [2, 0, 0], sizes = [1, 8, 128], strides = [1, 1, 1]} : vector<16x8x128xf32> to vector<1x8x128xf32>
    %71 = vector.shape_cast %70 : vector<1x8x128xf32> to vector<8x128xf32>
    %72 = arith.maximumf %69, %71 : vector<8x128xf32>
    %73 = vector.extract_strided_slice %12 {offsets = [3, 0, 0], sizes = [1, 8, 128], strides = [1, 1, 1]} : vector<16x8x128xf32> to vector<1x8x128xf32>
    %74 = vector.shape_cast %73 : vector<1x8x128xf32> to vector<8x128xf32>
    %75 = arith.maximumf %72, %74 : vector<8x128xf32>
    %76 = vector.extract_strided_slice %22 {offsets = [1, 0, 0], sizes = [1, 8, 128], strides = [1, 1, 1]} : vector<16x8x128xf32> to vector<1x8x128xf32>
    %77 = vector.shape_cast %76 : vector<1x8x128xf32> to vector<8x128xf32>
    %78 = vector.extract_strided_slice %22 {offsets = [2, 0, 0], sizes = [1, 8, 128], strides = [1, 1, 1]} : vector<16x8x128xf32> to vector<1x8x128xf32>
    %79 = vector.shape_cast %78 : vector<1x8x128xf32> to vector<8x128xf32>
    %80 = arith.maximumf %77, %79 : vector<8x128xf32>
    %81 = vector.extract_strided_slice %22 {offsets = [3, 0, 0], sizes = [1, 8, 128], strides = [1, 1, 1]} : vector<16x8x128xf32> to vector<1x8x128xf32>
    %82 = vector.shape_cast %81 : vector<1x8x128xf32> to vector<8x128xf32>
    %83 = arith.maximumf %80, %82 : vector<8x128xf32>
    %84 = arith.maximumf %75, %83 : vector<8x128xf32>
    %c1_i32_28 = arith.constant 1 : i32
    %85 = tpu.dynamic_rotate %83 by %c1_i32_28 dim 0 : vector<8x128xf32>, i32 -> vector<8x128xf32>
    %86 = vector.extract_strided_slice %83 {offsets = [0, 0], sizes = [1, 128], strides = [1, 1]} : vector<8x128xf32> to vector<1x128xf32>
    %87 = vector.shape_cast %43 : vector<8x1xi1> to vector<8x1xi1>
    %88 = vector.broadcast %87 : vector<8x1xi1> to vector<8x128xi1>
    %89 = vector.shape_cast %86 : vector<1x128xf32> to vector<1x128xf32>
    %90 = vector.broadcast %89 : vector<1x128xf32> to vector<8x128xf32>
    %91 = arith.select %88, %90, %85 : vector<8x128xi1>, vector<8x128xf32>
    %92 = arith.maximumf %84, %91 : vector<8x128xf32>
    %c0_29 = arith.constant 0 : index
    %c1 = arith.constant 1 : index
    %c0_30 = arith.constant 0 : index
    %c0_31 = arith.constant 0 : index
    %93 = vector.load %arg9[%c0_29, %c1, %c0_30, %c0_31] : memref<1x8x8x128xf32, #tpu.memory_space<vmem>>, vector<1x1x8x128xf32>
    %94 = vector.shape_cast %93 : vector<1x1x8x128xf32> to vector<8x128xf32>
    %95 = vector.shape_cast %92 : vector<8x128xf32> to vector<1x1x8x128xf32>
    tpu.vector_store %arg9[%c0_29, %c1, %c0_30, %c0_31], %95 {strides = array<i32>} : memref<1x8x8x128xf32, #tpu.memory_space<vmem>>, vector<1x1x8x128xf32>,
    %96 = vector.extract_strided_slice %12 {offsets = [3, 0, 0], sizes = [1, 8, 128], strides = [1, 1, 1]} : vector<16x8x128xf32> to vector<1x8x128xf32>
    %97 = vector.shape_cast %96 : vector<1x8x128xf32> to vector<8x128xf32>
    %98 = vector.extract_strided_slice %12 {offsets = [4, 0, 0], sizes = [1, 8, 128], strides = [1, 1, 1]} : vector<16x8x128xf32> to vector<1x8x128xf32>
    %99 = vector.shape_cast %98 : vector<1x8x128xf32> to vector<8x128xf32>
    %100 = arith.maximumf %97, %99 : vector<8x128xf32>
    %101 = vector.extract_strided_slice %12 {offsets = [5, 0, 0], sizes = [1, 8, 128], strides = [1, 1, 1]} : vector<16x8x128xf32> to vector<1x8x128xf32>
    %102 = vector.shape_cast %101 : vector<1x8x128xf32> to vector<8x128xf32>
    %103 = arith.maximumf %100, %102 : vector<8x128xf32>
    %104 = vector.extract_strided_slice %22 {offsets = [3, 0, 0], sizes = [1, 8, 128], strides = [1, 1, 1]} : vector<16x8x128xf32> to vector<1x8x128xf32>
    %105 = vector.shape_cast %104 : vector<1x8x128xf32> to vector<8x128xf32>
    %106 = vector.extract_strided_slice %22 {offsets = [4, 0, 0], sizes = [1, 8, 128], strides = [1, 1, 1]} : vector<16x8x128xf32> to vector<1x8x128xf32>
    %107 = vector.shape_cast %106 : vector<1x8x128xf32> to vector<8x128xf32>
    %108 = arith.maximumf %105, %107 : vector<8x128xf32>
    %109 = vector.extract_strided_slice %22 {offsets = [5, 0, 0], sizes = [1, 8, 128], strides = [1, 1, 1]} : vector<16x8x128xf32> to vector<1x8x128xf32>
    %110 = vector.shape_cast %109 : vector<1x8x128xf32> to vector<8x128xf32>
    %111 = arith.maximumf %108, %110 : vector<8x128xf32>
    %112 = arith.maximumf %103, %111 : vector<8x128xf32>
    %c1_i32_32 = arith.constant 1 : i32
    %113 = tpu.dynamic_rotate %111 by %c1_i32_32 dim 0 : vector<8x128xf32>, i32 -> vector<8x128xf32>
    %114 = vector.extract_strided_slice %111 {offsets = [0, 0], sizes = [1, 128], strides = [1, 1]} : vector<8x128xf32> to vector<1x128xf32>
    %115 = vector.shape_cast %43 : vector<8x1xi1> to vector<8x1xi1>
    %116 = vector.broadcast %115 : vector<8x1xi1> to vector<8x128xi1>
    %117 = vector.shape_cast %114 : vector<1x128xf32> to vector<1x128xf32>
    %118 = vector.broadcast %117 : vector<1x128xf32> to vector<8x128xf32>
    %119 = arith.select %116, %118, %113 : vector<8x128xi1>, vector<8x128xf32>
    %120 = arith.maximumf %112, %119 : vector<8x128xf32>
    %c0_33 = arith.constant 0 : index
    %c2 = arith.constant 2 : index
    %c0_34 = arith.constant 0 : index
    %c0_35 = arith.constant 0 : index
    %121 = vector.load %arg9[%c0_33, %c2, %c0_34, %c0_35] : memref<1x8x8x128xf32, #tpu.memory_space<vmem>>, vector<1x1x8x128xf32>
    %122 = vector.shape_cast %121 : vector<1x1x8x128xf32> to vector<8x128xf32>
    %123 = vector.shape_cast %120 : vector<8x128xf32> to vector<1x1x8x128xf32>
    tpu.vector_store %arg9[%c0_33, %c2, %c0_34, %c0_35], %123 {strides = array<i32>} : memref<1x8x8x128xf32, #tpu.memory_space<vmem>>, vector<1x1x8x128xf32>,
    %124 = vector.extract_strided_slice %12 {offsets = [5, 0, 0], sizes = [1, 8, 128], strides = [1, 1, 1]} : vector<16x8x128xf32> to vector<1x8x128xf32>
    %125 = vector.shape_cast %124 : vector<1x8x128xf32> to vector<8x128xf32>
    %126 = vector.extract_strided_slice %12 {offsets = [6, 0, 0], sizes = [1, 8, 128], strides = [1, 1, 1]} : vector<16x8x128xf32> to vector<1x8x128xf32>
    %127 = vector.shape_cast %126 : vector<1x8x128xf32> to vector<8x128xf32>
    %128 = arith.maximumf %125, %127 : vector<8x128xf32>
    %129 = vector.extract_strided_slice %12 {offsets = [7, 0, 0], sizes = [1, 8, 128], strides = [1, 1, 1]} : vector<16x8x128xf32> to vector<1x8x128xf32>
    %130 = vector.shape_cast %129 : vector<1x8x128xf32> to vector<8x128xf32>
    %131 = arith.maximumf %128, %130 : vector<8x128xf32>
    %132 = vector.extract_strided_slice %22 {offsets = [5, 0, 0], sizes = [1, 8, 128], strides = [1, 1, 1]} : vector<16x8x128xf32> to vector<1x8x128xf32>
    %133 = vector.shape_cast %132 : vector<1x8x128xf32> to vector<8x128xf32>
    %134 = vector.extract_strided_slice %22 {offsets = [6, 0, 0], sizes = [1, 8, 128], strides = [1, 1, 1]} : vector<16x8x128xf32> to vector<1x8x128xf32>
    %135 = vector.shape_cast %134 : vector<1x8x128xf32> to vector<8x128xf32>
    %136 = arith.maximumf %133, %135 : vector<8x128xf32>
    %137 = vector.extract_strided_slice %22 {offsets = [7, 0, 0], sizes = [1, 8, 128], strides = [1, 1, 1]} : vector<16x8x128xf32> to vector<1x8x128xf32>
    %138 = vector.shape_cast %137 : vector<1x8x128xf32> to vector<8x128xf32>
    %139 = arith.maximumf %136, %138 : vector<8x128xf32>
    %140 = arith.maximumf %131, %139 : vector<8x128xf32>
    %c1_i32_36 = arith.constant 1 : i32
    %141 = tpu.dynamic_rotate %139 by %c1_i32_36 dim 0 : vector<8x128xf32>, i32 -> vector<8x128xf32>
    %142 = vector.extract_strided_slice %139 {offsets = [0, 0], sizes = [1, 128], strides = [1, 1]} : vector<8x128xf32> to vector<1x128xf32>
    %143 = vector.shape_cast %43 : vector<8x1xi1> to vector<8x1xi1>
    %144 = vector.broadcast %143 : vector<8x1xi1> to vector<8x128xi1>
    %145 = vector.shape_cast %142 : vector<1x128xf32> to vector<1x128xf32>
    %146 = vector.broadcast %145 : vector<1x128xf32> to vector<8x128xf32>
    %147 = arith.select %144, %146, %141 : vector<8x128xi1>, vector<8x128xf32>
    %148 = arith.maximumf %140, %147 : vector<8x128xf32>
    %c0_37 = arith.constant 0 : index
    %c3 = arith.constant 3 : index
    %c0_38 = arith.constant 0 : index
    %c0_39 = arith.constant 0 : index
    %149 = vector.load %arg9[%c0_37, %c3, %c0_38, %c0_39] : memref<1x8x8x128xf32, #tpu.memory_space<vmem>>, vector<1x1x8x128xf32>
    %150 = vector.shape_cast %149 : vector<1x1x8x128xf32> to vector<8x128xf32>
    %151 = vector.shape_cast %148 : vector<8x128xf32> to vector<1x1x8x128xf32>
    tpu.vector_store %arg9[%c0_37, %c3, %c0_38, %c0_39], %151 {strides = array<i32>} : memref<1x8x8x128xf32, #tpu.memory_space<vmem>>, vector<1x1x8x128xf32>,
    %152 = vector.extract_strided_slice %12 {offsets = [7, 0, 0], sizes = [1, 8, 128], strides = [1, 1, 1]} : vector<16x8x128xf32> to vector<1x8x128xf32>
    %153 = vector.shape_cast %152 : vector<1x8x128xf32> to vector<8x128xf32>
    %154 = vector.extract_strided_slice %12 {offsets = [8, 0, 0], sizes = [1, 8, 128], strides = [1, 1, 1]} : vector<16x8x128xf32> to vector<1x8x128xf32>
    %155 = vector.shape_cast %154 : vector<1x8x128xf32> to vector<8x128xf32>
    %156 = arith.maximumf %153, %155 : vector<8x128xf32>
    %157 = vector.extract_strided_slice %12 {offsets = [9, 0, 0], sizes = [1, 8, 128], strides = [1, 1, 1]} : vector<16x8x128xf32> to vector<1x8x128xf32>
    %158 = vector.shape_cast %157 : vector<1x8x128xf32> to vector<8x128xf32>
    %159 = arith.maximumf %156, %158 : vector<8x128xf32>
    %160 = vector.extract_strided_slice %22 {offsets = [7, 0, 0], sizes = [1, 8, 128], strides = [1, 1, 1]} : vector<16x8x128xf32> to vector<1x8x128xf32>
    %161 = vector.shape_cast %160 : vector<1x8x128xf32> to vector<8x128xf32>
    %162 = vector.extract_strided_slice %22 {offsets = [8, 0, 0], sizes = [1, 8, 128], strides = [1, 1, 1]} : vector<16x8x128xf32> to vector<1x8x128xf32>
    %163 = vector.shape_cast %162 : vector<1x8x128xf32> to vector<8x128xf32>
    %164 = arith.maximumf %161, %163 : vector<8x128xf32>
    %165 = vector.extract_strided_slice %22 {offsets = [9, 0, 0], sizes = [1, 8, 128], strides = [1, 1, 1]} : vector<16x8x128xf32> to vector<1x8x128xf32>
    %166 = vector.shape_cast %165 : vector<1x8x128xf32> to vector<8x128xf32>
    %167 = arith.maximumf %164, %166 : vector<8x128xf32>
    %168 = arith.maximumf %159, %167 : vector<8x128xf32>
    %c1_i32_40 = arith.constant 1 : i32
    %169 = tpu.dynamic_rotate %167 by %c1_i32_40 dim 0 : vector<8x128xf32>, i32 -> vector<8x128xf32>
    %170 = vector.extract_strided_slice %167 {offsets = [0, 0], sizes = [1, 128], strides = [1, 1]} : vector<8x128xf32> to vector<1x128xf32>
    %171 = vector.shape_cast %43 : vector<8x1xi1> to vector<8x1xi1>
    %172 = vector.broadcast %171 : vector<8x1xi1> to vector<8x128xi1>
    %173 = vector.shape_cast %170 : vector<1x128xf32> to vector<1x128xf32>
    %174 = vector.broadcast %173 : vector<1x128xf32> to vector<8x128xf32>
    %175 = arith.select %172, %174, %169 : vector<8x128xi1>, vector<8x128xf32>
    %176 = arith.maximumf %168, %175 : vector<8x128xf32>
    %c0_41 = arith.constant 0 : index
    %c4 = arith.constant 4 : index
    %c0_42 = arith.constant 0 : index
    %c0_43 = arith.constant 0 : index
    %177 = vector.load %arg9[%c0_41, %c4, %c0_42, %c0_43] : memref<1x8x8x128xf32, #tpu.memory_space<vmem>>, vector<1x1x8x128xf32>
    %178 = vector.shape_cast %177 : vector<1x1x8x128xf32> to vector<8x128xf32>
    %179 = vector.shape_cast %176 : vector<8x128xf32> to vector<1x1x8x128xf32>
    tpu.vector_store %arg9[%c0_41, %c4, %c0_42, %c0_43], %179 {strides = array<i32>} : memref<1x8x8x128xf32, #tpu.memory_space<vmem>>, vector<1x1x8x128xf32>,
    %180 = vector.extract_strided_slice %12 {offsets = [9, 0, 0], sizes = [1, 8, 128], strides = [1, 1, 1]} : vector<16x8x128xf32> to vector<1x8x128xf32>
    %181 = vector.shape_cast %180 : vector<1x8x128xf32> to vector<8x128xf32>
    %182 = vector.extract_strided_slice %12 {offsets = [10, 0, 0], sizes = [1, 8, 128], strides = [1, 1, 1]} : vector<16x8x128xf32> to vector<1x8x128xf32>
    %183 = vector.shape_cast %182 : vector<1x8x128xf32> to vector<8x128xf32>
    %184 = arith.maximumf %181, %183 : vector<8x128xf32>
    %185 = vector.extract_strided_slice %12 {offsets = [11, 0, 0], sizes = [1, 8, 128], strides = [1, 1, 1]} : vector<16x8x128xf32> to vector<1x8x128xf32>
    %186 = vector.shape_cast %185 : vector<1x8x128xf32> to vector<8x128xf32>
    %187 = arith.maximumf %184, %186 : vector<8x128xf32>
    %188 = vector.extract_strided_slice %22 {offsets = [9, 0, 0], sizes = [1, 8, 128], strides = [1, 1, 1]} : vector<16x8x128xf32> to vector<1x8x128xf32>
    %189 = vector.shape_cast %188 : vector<1x8x128xf32> to vector<8x128xf32>
    %190 = vector.extract_strided_slice %22 {offsets = [10, 0, 0], sizes = [1, 8, 128], strides = [1, 1, 1]} : vector<16x8x128xf32> to vector<1x8x128xf32>
    %191 = vector.shape_cast %190 : vector<1x8x128xf32> to vector<8x128xf32>
    %192 = arith.maximumf %189, %191 : vector<8x128xf32>
    %193 = vector.extract_strided_slice %22 {offsets = [11, 0, 0], sizes = [1, 8, 128], strides = [1, 1, 1]} : vector<16x8x128xf32> to vector<1x8x128xf32>
    %194 = vector.shape_cast %193 : vector<1x8x128xf32> to vector<8x128xf32>
    %195 = arith.maximumf %192, %194 : vector<8x128xf32>
    %196 = arith.maximumf %187, %195 : vector<8x128xf32>
    %c1_i32_44 = arith.constant 1 : i32
    %197 = tpu.dynamic_rotate %195 by %c1_i32_44 dim 0 : vector<8x128xf32>, i32 -> vector<8x128xf32>
    %198 = vector.extract_strided_slice %195 {offsets = [0, 0], sizes = [1, 128], strides = [1, 1]} : vector<8x128xf32> to vector<1x128xf32>
    %199 = vector.shape_cast %43 : vector<8x1xi1> to vector<8x1xi1>
    %200 = vector.broadcast %199 : vector<8x1xi1> to vector<8x128xi1>
    %201 = vector.shape_cast %198 : vector<1x128xf32> to vector<1x128xf32>
    %202 = vector.broadcast %201 : vector<1x128xf32> to vector<8x128xf32>
    %203 = arith.select %200, %202, %197 : vector<8x128xi1>, vector<8x128xf32>
    %204 = arith.maximumf %196, %203 : vector<8x128xf32>
    %c0_45 = arith.constant 0 : index
    %c5 = arith.constant 5 : index
    %c0_46 = arith.constant 0 : index
    %c0_47 = arith.constant 0 : index
    %205 = vector.load %arg9[%c0_45, %c5, %c0_46, %c0_47] : memref<1x8x8x128xf32, #tpu.memory_space<vmem>>, vector<1x1x8x128xf32>
    %206 = vector.shape_cast %205 : vector<1x1x8x128xf32> to vector<8x128xf32>
    %207 = vector.shape_cast %204 : vector<8x128xf32> to vector<1x1x8x128xf32>
    tpu.vector_store %arg9[%c0_45, %c5, %c0_46, %c0_47], %207 {strides = array<i32>} : memref<1x8x8x128xf32, #tpu.memory_space<vmem>>, vector<1x1x8x128xf32>,
    %208 = vector.extract_strided_slice %12 {offsets = [11, 0, 0], sizes = [1, 8, 128], strides = [1, 1, 1]} : vector<16x8x128xf32> to vector<1x8x128xf32>
    %209 = vector.shape_cast %208 : vector<1x8x128xf32> to vector<8x128xf32>
    %210 = vector.extract_strided_slice %12 {offsets = [12, 0, 0], sizes = [1, 8, 128], strides = [1, 1, 1]} : vector<16x8x128xf32> to vector<1x8x128xf32>
    %211 = vector.shape_cast %210 : vector<1x8x128xf32> to vector<8x128xf32>
    %212 = arith.maximumf %209, %211 : vector<8x128xf32>
    %213 = vector.extract_strided_slice %12 {offsets = [13, 0, 0], sizes = [1, 8, 128], strides = [1, 1, 1]} : vector<16x8x128xf32> to vector<1x8x128xf32>
    %214 = vector.shape_cast %213 : vector<1x8x128xf32> to vector<8x128xf32>
    %215 = arith.maximumf %212, %214 : vector<8x128xf32>
    %216 = vector.extract_strided_slice %22 {offsets = [11, 0, 0], sizes = [1, 8, 128], strides = [1, 1, 1]} : vector<16x8x128xf32> to vector<1x8x128xf32>
    %217 = vector.shape_cast %216 : vector<1x8x128xf32> to vector<8x128xf32>
    %218 = vector.extract_strided_slice %22 {offsets = [12, 0, 0], sizes = [1, 8, 128], strides = [1, 1, 1]} : vector<16x8x128xf32> to vector<1x8x128xf32>
    %219 = vector.shape_cast %218 : vector<1x8x128xf32> to vector<8x128xf32>
    %220 = arith.maximumf %217, %219 : vector<8x128xf32>
    %221 = vector.extract_strided_slice %22 {offsets = [13, 0, 0], sizes = [1, 8, 128], strides = [1, 1, 1]} : vector<16x8x128xf32> to vector<1x8x128xf32>
    %222 = vector.shape_cast %221 : vector<1x8x128xf32> to vector<8x128xf32>
    %223 = arith.maximumf %220, %222 : vector<8x128xf32>
    %224 = arith.maximumf %215, %223 : vector<8x128xf32>
    %c1_i32_48 = arith.constant 1 : i32
    %225 = tpu.dynamic_rotate %223 by %c1_i32_48 dim 0 : vector<8x128xf32>, i32 -> vector<8x128xf32>
    %226 = vector.extract_strided_slice %223 {offsets = [0, 0], sizes = [1, 128], strides = [1, 1]} : vector<8x128xf32> to vector<1x128xf32>
    %227 = vector.shape_cast %43 : vector<8x1xi1> to vector<8x1xi1>
    %228 = vector.broadcast %227 : vector<8x1xi1> to vector<8x128xi1>
    %229 = vector.shape_cast %226 : vector<1x128xf32> to vector<1x128xf32>
    %230 = vector.broadcast %229 : vector<1x128xf32> to vector<8x128xf32>
    %231 = arith.select %228, %230, %225 : vector<8x128xi1>, vector<8x128xf32>
    %232 = arith.maximumf %224, %231 : vector<8x128xf32>
    %c0_49 = arith.constant 0 : index
    %c6 = arith.constant 6 : index
    %c0_50 = arith.constant 0 : index
    %c0_51 = arith.constant 0 : index
    %233 = vector.load %arg9[%c0_49, %c6, %c0_50, %c0_51] : memref<1x8x8x128xf32, #tpu.memory_space<vmem>>, vector<1x1x8x128xf32>
    %234 = vector.shape_cast %233 : vector<1x1x8x128xf32> to vector<8x128xf32>
    %235 = vector.shape_cast %232 : vector<8x128xf32> to vector<1x1x8x128xf32>
    tpu.vector_store %arg9[%c0_49, %c6, %c0_50, %c0_51], %235 {strides = array<i32>} : memref<1x8x8x128xf32, #tpu.memory_space<vmem>>, vector<1x1x8x128xf32>,
    %236 = vector.extract_strided_slice %12 {offsets = [13, 0, 0], sizes = [1, 8, 128], strides = [1, 1, 1]} : vector<16x8x128xf32> to vector<1x8x128xf32>
    %237 = vector.shape_cast %236 : vector<1x8x128xf32> to vector<8x128xf32>
    %238 = vector.extract_strided_slice %12 {offsets = [14, 0, 0], sizes = [1, 8, 128], strides = [1, 1, 1]} : vector<16x8x128xf32> to vector<1x8x128xf32>
    %239 = vector.shape_cast %238 : vector<1x8x128xf32> to vector<8x128xf32>
    %240 = arith.maximumf %237, %239 : vector<8x128xf32>
    %241 = vector.extract_strided_slice %12 {offsets = [15, 0, 0], sizes = [1, 8, 128], strides = [1, 1, 1]} : vector<16x8x128xf32> to vector<1x8x128xf32>
    %242 = vector.shape_cast %241 : vector<1x8x128xf32> to vector<8x128xf32>
    %243 = arith.maximumf %240, %242 : vector<8x128xf32>
    %244 = vector.extract_strided_slice %22 {offsets = [13, 0, 0], sizes = [1, 8, 128], strides = [1, 1, 1]} : vector<16x8x128xf32> to vector<1x8x128xf32>
    %245 = vector.shape_cast %244 : vector<1x8x128xf32> to vector<8x128xf32>
    %246 = vector.extract_strided_slice %22 {offsets = [14, 0, 0], sizes = [1, 8, 128], strides = [1, 1, 1]} : vector<16x8x128xf32> to vector<1x8x128xf32>
    %247 = vector.shape_cast %246 : vector<1x8x128xf32> to vector<8x128xf32>
    %248 = arith.maximumf %245, %247 : vector<8x128xf32>
    %249 = vector.extract_strided_slice %22 {offsets = [15, 0, 0], sizes = [1, 8, 128], strides = [1, 1, 1]} : vector<16x8x128xf32> to vector<1x8x128xf32>
    %250 = vector.shape_cast %249 : vector<1x8x128xf32> to vector<8x128xf32>
    %251 = arith.maximumf %248, %250 : vector<8x128xf32>
    %252 = arith.maximumf %243, %251 : vector<8x128xf32>
    %c1_i32_52 = arith.constant 1 : i32
    %253 = tpu.dynamic_rotate %251 by %c1_i32_52 dim 0 : vector<8x128xf32>, i32 -> vector<8x128xf32>
    %254 = vector.extract_strided_slice %251 {offsets = [0, 0], sizes = [1, 128], strides = [1, 1]} : vector<8x128xf32> to vector<1x128xf32>
    %255 = vector.shape_cast %43 : vector<8x1xi1> to vector<8x1xi1>
    %256 = vector.broadcast %255 : vector<8x1xi1> to vector<8x128xi1>
    %257 = vector.shape_cast %254 : vector<1x128xf32> to vector<1x128xf32>
    %258 = vector.broadcast %257 : vector<1x128xf32> to vector<8x128xf32>
    %259 = arith.select %256, %258, %253 : vector<8x128xi1>, vector<8x128xf32>
    %260 = arith.maximumf %252, %259 : vector<8x128xf32>
    %c0_53 = arith.constant 0 : index
    %c7 = arith.constant 7 : index
    %c0_54 = arith.constant 0 : index
    %c0_55 = arith.constant 0 : index
    %261 = vector.load %arg9[%c0_53, %c7, %c0_54, %c0_55] : memref<1x8x8x128xf32, #tpu.memory_space<vmem>>, vector<1x1x8x128xf32>
    %262 = vector.shape_cast %261 : vector<1x1x8x128xf32> to vector<8x128xf32>
    %263 = vector.shape_cast %260 : vector<8x128xf32> to vector<1x1x8x128xf32>
    tpu.vector_store %arg9[%c0_53, %c7, %c0_54, %c0_55], %263 {strides = array<i32>} : memref<1x8x8x128xf32, #tpu.memory_space<vmem>>, vector<1x1x8x128xf32>,
    return
  }
  func.func @transform_0(%arg0: i32, %arg1: i32) -> (i32, i32, i32) {
    %c0_i32 = arith.constant 0 : i32
    %c0_i32_0 = arith.constant 0 : i32
    return %arg0, %arg1, %c0_i32 : i32, i32, i32
  }
  func.func @transform_1(%arg0: i32, %arg1: i32) -> (i32, i32, i32) {
    %c16_i32 = arith.constant 16 : i32
    %0 = arith.muli %c16_i32, %arg1 : i32
    %c1_i32 = arith.constant 1 : i32
    %1 = arith.subi %0, %c1_i32 : i32
    %c0_i32 = arith.constant 0 : i32
    %2 = arith.maxsi %1, %c0_i32 : i32
    %c0_i32_0 = arith.constant 0 : i32
    %c0_i32_1 = arith.constant 0 : i32
    return %arg0, %2, %c0_i32_0 : i32, i32, i32
  }
  func.func @transform_2(%arg0: i32, %arg1: i32) -> (i32, i32, i32) {
    %c0_i32 = arith.constant 0 : i32
    %c0_i32_0 = arith.constant 0 : i32
    return %arg0, %arg1, %c0_i32 : i32, i32, i32
  }
  func.func @transform_3(%arg0: i32, %arg1: i32) -> (i32, i32, i32) {
    %c16_i32 = arith.constant 16 : i32
    %0 = arith.muli %c16_i32, %arg1 : i32
    %c1_i32 = arith.constant 1 : i32
    %1 = arith.subi %0, %c1_i32 : i32
    %c0_i32 = arith.constant 0 : i32
    %2 = arith.maxsi %1, %c0_i32 : i32
    %c0_i32_0 = arith.constant 0 : i32
    %c0_i32_1 = arith.constant 0 : i32
    return %arg0, %2, %c0_i32_0 : i32, i32, i32
  }
  func.func @transform_4(%arg0: i32, %arg1: i32) -> (i32, i32) {
    %c0_i32 = arith.constant 0 : i32
    %c0_i32_0 = arith.constant 0 : i32
    %c0_i32_1 = arith.constant 0 : i32
    return %c0_i32, %c0_i32_0 : i32, i32
  }
  func.func @transform_5(%arg0: i32, %arg1: i32) -> (i32, i32) {
    %c0_i32 = arith.constant 0 : i32
    %c0_i32_0 = arith.constant 0 : i32
    %c0_i32_1 = arith.constant 0 : i32
    return %c0_i32, %c0_i32_0 : i32, i32
  }
  func.func @transform_6(%arg0: i32, %arg1: i32) -> (i32, i32) {
    %c0_i32 = arith.constant 0 : i32
    %c0_i32_0 = arith.constant 0 : i32
    %c0_i32_1 = arith.constant 0 : i32
    return %c0_i32, %c0_i32_0 : i32, i32
  }
  func.func @transform_7(%arg0: i32, %arg1: i32) -> (i32, i32, i32, i32) {
    %c0_i32 = arith.constant 0 : i32
    %c0_i32_0 = arith.constant 0 : i32
    %c0_i32_1 = arith.constant 0 : i32
    return %arg0, %arg1, %c0_i32, %c0_i32_0 : i32, i32, i32, i32
  }
}

</mosaic_0001>

<bundles_post_ra>
// kernel: thermal_module_forward.1
= control target key start
LH: loop header
LB: loop body
LE: loop exit
PB: predicated region body
PF: predicated region fallthrough
CT: control target
= control target key end

     0   :  { %s1721_s24 = smov 0   ;;  %s1723_s25 = smov 0   ;;  %s2095_s0 = inlined_call_operand.vmem [shape: bf16[2,128,147], index: 0, kind: input, shape index: {}, may-alias: {0,1}]   ;;  %s2096_s1 = inlined_call_operand.vmem [shape: bf16[2,128,147], index: 1, kind: input, shape index: {}, may-alias: {0,1}]   ;;  %s2097_s2 = inlined_call_operand.vmem [shape: bf16[2,128,147], index: 2, kind: input, shape index: {}, may-alias: {2,3}]   ;;  %s2098_s3 = inlined_call_operand.vmem [shape: bf16[2,128,147], index: 3, kind: input, shape index: {}, may-alias: {2,3}]   ;;  %s2099_s4 = inlined_call_operand.vmem [shape: bf16[147,128], index: 4, kind: input, shape index: {}]   ;;  %s2100_s5 = inlined_call_operand.vmem [shape: f32[1,128], index: 5, kind: input, shape index: {}]   ;;  %s2101_s6 = inlined_call_operand.vmem [shape: f32[1,128], index: 6, kind: input, shape index: {}]   ;;  %s2102_s7 = inlined_call_operand.vmem [shape: f32[2,8,8,128], index: 7, kind: output, shape index: {}]  }
   0x1   :  { %s1725_s26 = smov 0  }
   0x2 LB: > { %s29_s27 = sadd.s32 1, %s1673_s25  ;;  %p1476_p0 = scmp.ge.s32.totalorder %s1677_s26, 1  ;;  %s1677_s26 = sphi %s1725_s26, %s17_s26   ;;  %s1673_s25 = sphi %s1723_s25, %s2104_s25   ;;  %s1669_s24 = sphi %s1721_s24, %s2103_s24  }
   0x3   : > { %p31_p1 = scmp.ge.s32.totalorder %s29_s27, 2  ;;  %p341_p2 = scmp.lt.s32.totalorder %s1677_s26, 3 }
   0x5   : > { %s2106_s27 = smov (%p31_p1, %s29_s27), 0  ;;  %p342_p3 = pnand %p1476_p0, %p341_p2 }
   0x6   : > { %v1742_v0 = vld [vmem:[%s2099_s4] sm:$0xff] (!%p342_p3)   ;;  %v1679_v1 = vmov (!%p342_p3), 0   ;;  %v1751_v2 = vld [vmem:[%s2099_s4 + $0x8] sm:$0xff] (!%p342_p3)   ;;  %v1760_v3 = vld [vmem:[%s2099_s4 + $0x10] sm:$0xff] (!%p342_p3)   ;;  %p419_p4 = scmp.lt.s32.totalorder (!%p342_p3), %s1669_s24, 1  ;;  %vm651_vm0 = vcmask (!%p342_p3), 154624  }
   0x7   : > { %345 = sbr.rel (%p342_p3) target bundleno = 339 (0x153), region = 48  ;;  %683 = vmatprep.subr.bf16.mxu0 (!%p342_p3), %v1679_v1  ;;  %952 = vmatprep.subr.bf16.mxu1 (!%p342_p3), %v1679_v1  ;;  %v1771_v4 = vld [vmem:[%s2099_s4 + $0x18] sm:$0xff] (!%p342_p3)   ;;  %v1796_v6 = vld [vmem:[%s2099_s4 + $0x20] sm:$0xff] (!%p342_p3)   ;;  %v1808_v8 = vld [vmem:[%s2099_s4 + $0x28] sm:$0xff] (!%p342_p3)   ;;  %vm676_vm1 = vcmask (!%p342_p3), 1040384   ;;  %vm677_vm2 = vcmask (!%p342_p3), 1041408  }
   0x8   : > { %684 = vmatpush1.bf16.msra.mxu0 (!%p342_p3), %v1742_v0  ;;  %953 = vmatpush1.bf16.msra.mxu1 (!%p342_p3), %v1742_v0  ;;  %v1817_v9 = vld [vmem:[%s2099_s4 + $0x30] sm:$0xff] (!%p342_p3)   ;;  %v1826_v10 = vld [vmem:[%s2099_s4 + $0x38] sm:$0xff] (!%p342_p3)   ;;  %v1680_v11 = vmov (!%p342_p3), 65535   ;;  %v1835_v13 = vld [vmem:[%s2099_s4 + $0x40] sm:$0xff] (!%p342_p3)  }
   0x9   : > { %685 = vmatprep.subr.bf16.mxu0 (!%p342_p3), %v1679_v1  ;;  %954 = vmatprep.subr.bf16.mxu1 (!%p342_p3), %v1679_v1  ;;  %v678_v12 = vsel (!%p342_p3), %vm676_vm1, 4294967295, %v1680_v11  ;;  %v1602_v14 = vld [vmem:[%s2099_s4 + $0x48] ss:$0 sps:$4 sm:$0x33] (!%p342_p3)   ;;  %v1951_v59 = vld [vmem:[%s2100_s5] ss:$0 sm:$0xff] (!%p342_p3) }
   0xa   : > { %v679_v15 = vsel (!%p342_p3), %vm677_vm2, %v678_v12, 0 }
   0xb   : > { %v1844_v16 = vand.u32 (!%p342_p3), %v1602_v14, %v679_v15 }
   0xc   : > { %686 = vmatpush1.bf16.msra.mxu0 (!%p342_p3), %v1751_v2  ;;  %955 = vmatpush1.bf16.msra.mxu1 (!%p342_p3), %v1751_v2 }
   0xd   : > { %687 = vmatprep.subr.bf16.mxu0 (!%p342_p3), %v1679_v1  ;;  %956 = vmatprep.subr.bf16.mxu1 (!%p342_p3), %v1679_v1 }
   0xe   : > { %s2108_s24 = smov (!%p419_p4, %s1669_s24), 1 }
   0xf   : > { %s1774_s13 = sshll.u32 %s2108_s24, 7  ;;  %s1566_s23 = sshll.u32 %s2108_s24, 6 }
  0x10   : > { %688 = vmatpush1.bf16.msra.mxu0 %v1760_v3  ;;  %957 = vmatpush1.bf16.msra.mxu1 %v1760_v3  ;;  %s1782_s16 = scalar_lea.vmem %s2095_s0, %s1774_s13  ;;  %s1788_s19 = scalar_lea.vmem %s2097_s2, %s1774_s13 }
  0x11   : > { %689 = vmatprep.subr.bf16.mxu0 %v1679_v1  ;;  %958 = vmatprep.subr.bf16.mxu1 %v1679_v1  ;;  %v1605_v5 = vld [vmem:[%s1782_s16 + $0x4] ss:$8 sps:$4 sm:$0xff]   ;;  %v1603_v17 = vld [vmem:[%s1782_s16] ss:$8 sps:$4 sm:$0xff]   ;;  %v1609_v19 = vld [vmem:[%s1782_s16 + $0x14] ss:$8 sps:$4 sm:$0xff]   ;;  %s441_s17 = scalar_lea.vmem %s2096_s1, %s1774_s13  ;;  %s469_s21 = scalar_lea.vmem %s2098_s3, %s1774_s13 }
  0x12   : > { %v1608_v7 = vld [vmem:[%s1788_s19 + $0x4] ss:$8 sps:$4 sm:$0xff]   ;;  %1513 = vmatprep.mubr.msk.bf16.mxu0 %vm651_vm0, %v1605_v5  ;;  %v1606_v18 = vld [vmem:[%s1788_s19] ss:$8 sps:$4 sm:$0xff]   ;;  %v1611_v20 = vld [vmem:[%s1788_s19 + $0x14] ss:$8 sps:$4 sm:$0xff]   ;;  %s1997_s29 = scalar_lea.vmem %s2102_s7, %s1566_s23 }
  0x13   : > { %1539 = vmatprep.mubr.msk.bf16.mxu1 %vm651_vm0, %v1608_v7  ;;  %v1613_v21 = vld [vmem:[%s1782_s16 + $0x10] ss:$8 sps:$4 sm:$0xff]   ;;  %v1615_v23 = vld [vmem:[%s1782_s16 + $0x24] ss:$8 sps:$4 sm:$0xff]   ;;  %v1619_v25 = vld [vmem:[%s1782_s16 + $0x20] ss:$8 sps:$4 sm:$0xff]  }
  0x14   : > { %690 = vmatpush1.bf16.msra.mxu0 %v1771_v4  ;;  %959 = vmatpush1.bf16.msra.mxu1 %v1771_v4  ;;  %v1614_v22 = vld [vmem:[%s1788_s19 + $0x10] ss:$8 sps:$4 sm:$0xff]   ;;  %v1617_v24 = vld [vmem:[%s1788_s19 + $0x24] ss:$8 sps:$4 sm:$0xff]   ;;  %v1620_v26 = vld [vmem:[%s1788_s19 + $0x20] ss:$8 sps:$4 sm:$0xff]  }
  0x15   : > { %691 = vmatprep.subr.bf16.mxu0 %v1679_v1  ;;  %960 = vmatprep.subr.bf16.mxu1 %v1679_v1  ;;  %v1621_v27 = vld [vmem:[%s1782_s16 + $0x34] ss:$8 sps:$4 sm:$0xff]   ;;  %v1625_v29 = vld [vmem:[%s1782_s16 + $0x30] ss:$8 sps:$4 sm:$0xff]   ;;  %v1627_v31 = vld [vmem:[%s1782_s16 + $0x44] ss:$8 sps:$4 sm:$0xff]  }
  0x16   : > { %v1623_v28 = vld [vmem:[%s1788_s19 + $0x34] ss:$8 sps:$4 sm:$0xff]   ;;  %v1626_v30 = vld [vmem:[%s1788_s19 + $0x30] ss:$8 sps:$4 sm:$0xff]   ;;  %v1629_v32 = vld [vmem:[%s1788_s19 + $0x44] ss:$8 sps:$4 sm:$0xff]  }
  0x17   : > { %v1631_v33 = vld [vmem:[%s1782_s16 + $0x40] ss:$8 sps:$4 sm:$0xff]   ;;  %v1633_v35 = vld [vmem:[%s1782_s16 + $0x54] ss:$8 sps:$4 sm:$0xff]   ;;  %v1637_v37 = vld [vmem:[%s1782_s16 + $0x50] ss:$8 sps:$4 sm:$0xff]  }
  0x18   : > { %692 = vmatpush1.bf16.msra.mxu0 %v1796_v6  ;;  %961 = vmatpush1.bf16.msra.mxu1 %v1796_v6  ;;  %v1632_v34 = vld [vmem:[%s1788_s19 + $0x40] ss:$8 sps:$4 sm:$0xff]   ;;  %v1635_v36 = vld [vmem:[%s1788_s19 + $0x54] ss:$8 sps:$4 sm:$0xff]   ;;  %v1638_v38 = vld [vmem:[%s1788_s19 + $0x50] ss:$8 sps:$4 sm:$0xff]  }
  0x19   : > { %693 = vmatprep.subr.bf16.mxu0 %v1679_v1  ;;  %962 = vmatprep.subr.bf16.mxu1 %v1679_v1  ;;  %v1639_v39 = vld [vmem:[%s1782_s16 + $0x64] ss:$8 sps:$4 sm:$0xff]   ;;  %v1643_v41 = vld [vmem:[%s1782_s16 + $0x60] ss:$8 sps:$4 sm:$0xff]   ;;  %v1645_v43 = vld [vmem:[%s1782_s16 + $0x74] ss:$8 sps:$4 sm:$0xff]  }
  0x1a   : > { %v1641_v40 = vld [vmem:[%s1788_s19 + $0x64] ss:$8 sps:$4 sm:$0xff]   ;;  %v1644_v42 = vld [vmem:[%s1788_s19 + $0x60] ss:$8 sps:$4 sm:$0xff]   ;;  %v1647_v44 = vld [vmem:[%s1788_s19 + $0x74] ss:$8 sps:$4 sm:$0xff]  }
  0x1b   : > { %v1097_v45 = vld [vmem:[%s441_s17] sm:$0xff]  ;;  %v1649_v47 = vld [vmem:[%s1782_s16 + $0x70] ss:$8 sps:$4 sm:$0xff]  }
  0x1c   : > { %694 = vmatpush1.bf16.msra.mxu0 %v1808_v8  ;;  %963 = vmatpush1.bf16.msra.mxu1 %v1808_v8  ;;  %v1150_v46 = vld [vmem:[%s469_s21] sm:$0xff]  ;;  %v1650_v48 = vld [vmem:[%s1788_s19 + $0x70] ss:$8 sps:$4 sm:$0xff]   ;;  %v1548_v49 = vcombine.high %v1097_v45, %v1097_v45  ;;  %v1547_v51 = vcombine.low %v1097_v45, %v1097_v45 }
  0x1d   : > { %695 = vmatprep.subr.bf16.mxu0 %v1679_v1  ;;  %964 = vmatprep.subr.bf16.mxu1 %v1679_v1  ;;  %v1551_v50 = vcombine.high %v1150_v46, %v1150_v46  ;;  %v1550_v52 = vcombine.low %v1150_v46, %v1150_v46 }
  0x20   : > { %696 = vmatpush1.bf16.msra.mxu0 %v1817_v9  ;;  %965 = vmatpush1.bf16.msra.mxu1 %v1817_v9 }
  0x21   : > { %697 = vmatprep.subr.bf16.mxu0 %v1679_v1  ;;  %966 = vmatprep.subr.bf16.mxu1 %v1679_v1 }
  0x24   : > { %698 = vmatpush1.bf16.msra.mxu0 %v1826_v10  ;;  %967 = vmatpush1.bf16.msra.mxu1 %v1826_v10 }
  0x25   : > { %699 = vmatprep.subr.bf16.mxu0 %v1679_v1  ;;  %968 = vmatprep.subr.bf16.mxu1 %v1679_v1 }
  0x28   : > { %700 = vmatpush1.bf16.msra.mxu0 %v1835_v13  ;;  %969 = vmatpush1.bf16.msra.mxu1 %v1835_v13 }
  0x29   : > { %701 = vmatprep.subr.bf16.mxu0 %v1679_v1  ;;  %970 = vmatprep.subr.bf16.mxu1 %v1679_v1 }
  0x2c   : > { %702 = vmatpush1.bf16.msra.mxu0 %v1844_v16  ;;  %971 = vmatpush1.bf16.msra.mxu1 %v1844_v16 }
  0x2d   : > { %1160 = vmatprep.subr.bf16.mxu1 %v1679_v1  ;;  %1107 = vmatprep.subr.bf16.mxu0 %v1679_v1 }
  0x2f   : > { %716 = vmatmul.mubr.bf16.vlgmr.msra.gmra.mrb[0].mxu0 %v1603_v17  ;;  %985 = vmatmul.mubr.bf16.vlgmr.msra.gmra.mrb[0].mxu1 %v1606_v18 }
  0x30   : > { %1161 = vmatpush1.bf16.msra.mxu1 %v1742_v0  ;;  %1108 = vmatpush1.bf16.msra.mxu0 %v1742_v0  ;;  %v1203_v0 = vlaneseq }
  0x31   : > { %1514 = vmatprep.mubr.msk.bf16.mxu0 %vm651_vm0, %v1609_v19  ;;  %1540 = vmatprep.mubr.msk.bf16.mxu1 %vm651_vm0, %v1611_v20 }
  0x32   : > { %1162 = vmatprep.subr.bf16.mxu1 %v1679_v1  ;;  %1109 = vmatprep.subr.bf16.mxu0 %v1679_v1  ;;  %v1968_v12 = vshrl.u32 %v1203_v0, 7 }
  0x34   : > { %1163 = vmatpush1.bf16.msra.mxu1 %v1751_v2  ;;  %1110 = vmatpush1.bf16.msra.mxu0 %v1751_v2  ;;  %vm1205_vm3 = vcmp.eq.s32.totalorder %v1968_v12, 0 }
  0x35   : > { %1164 = vmatprep.subr.bf16.mxu1 %v1679_v1  ;;  %1111 = vmatprep.subr.bf16.mxu0 %v1679_v1 }
  0x37   : > { %724 = vmatmul.mubr.bf16.gmra.mrb[4].mxu0 %v1613_v21  ;;  %993 = vmatmul.mubr.bf16.gmra.mrb[4].mxu1 %v1614_v22 }
  0x38   : > { %1165 = vmatpush1.bf16.msra.mxu1 %v1760_v3  ;;  %1515 = vmatprep.mubr.msk.bf16.mxu0 %vm651_vm0, %v1615_v23 }
  0x39   : > { %1541 = vmatprep.mubr.msk.bf16.mxu1 %vm651_vm0, %v1617_v24  ;;  %1112 = vmatpush1.bf16.msra.mxu0 %v1760_v3 }
  0x3a   : > { %1166 = vmatprep.subr.bf16.mxu1 %v1679_v1  ;;  %1113 = vmatprep.subr.bf16.mxu0 %v1679_v1 }
  0x3c   : > { %1167 = vmatpush1.bf16.msra.mxu1 %v1771_v4 }
  0x3d   : > { %1114 = vmatpush1.bf16.msra.mxu0 %v1771_v4  ;;  %1168 = vmatprep.subr.bf16.mxu1 %v1679_v1 }
  0x3e   : > { %1115 = vmatprep.subr.bf16.mxu0 %v1679_v1 }
  0x3f   : > { %732 = vmatmul.mubr.bf16.gmra.mrb[8].mxu0 %v1619_v25  ;;  %1001 = vmatmul.mubr.bf16.gmra.mrb[8].mxu1 %v1620_v26  ;;  %v1979_v25 = vsub.s32 0, %v1968_v12 }
  0x40   : > { %1516 = vmatprep.mubr.msk.bf16.mxu0 %vm651_vm0, %v1621_v27  ;;  %1542 = vmatprep.mubr.msk.bf16.mxu1 %vm651_vm0, %v1623_v28 }
  0x41   : > { %1169 = vmatpush1.bf16.msra.mxu1 %v1796_v6  ;;  %1116 = vmatpush1.bf16.msra.mxu0 %v1796_v6 }
  0x42   : > { %1170 = vmatprep.subr.bf16.mxu1 %v1679_v1  ;;  %1117 = vmatprep.subr.bf16.mxu0 %v1679_v1 }
  0x45   : > { %1171 = vmatpush1.bf16.msra.mxu1 %v1808_v8  ;;  %1118 = vmatpush1.bf16.msra.mxu0 %v1808_v8 }
  0x46   : > { %1172 = vmatprep.subr.bf16.mxu1 %v1679_v1  ;;  %1119 = vmatprep.subr.bf16.mxu0 %v1679_v1 }
  0x47   : > { %740 = vmatmul.mubr.bf16.gmra.mrb[12].mxu0 %v1625_v29  ;;  %1009 = vmatmul.mubr.bf16.gmra.mrb[12].mxu1 %v1626_v30 }
  0x48   : > { %1517 = vmatprep.mubr.msk.bf16.mxu0 %vm651_vm0, %v1627_v31  ;;  %1543 = vmatprep.mubr.msk.bf16.mxu1 %vm651_vm0, %v1629_v32 }
  0x49   : > { %1173 = vmatpush1.bf16.msra.mxu1 %v1817_v9  ;;  %1120 = vmatpush1.bf16.msra.mxu0 %v1817_v9 }
  0x4a   : > { %1174 = vmatprep.subr.bf16.mxu1 %v1679_v1  ;;  %1121 = vmatprep.subr.bf16.mxu0 %v1679_v1 }
  0x4d   : > { %1175 = vmatpush1.bf16.msra.mxu1 %v1826_v10  ;;  %1122 = vmatpush1.bf16.msra.mxu0 %v1826_v10 }
  0x4e   : > { %1176 = vmatprep.subr.bf16.mxu1 %v1679_v1  ;;  %1123 = vmatprep.subr.bf16.mxu0 %v1679_v1 }
  0x4f   : > { %748 = vmatmul.mubr.bf16.gmra.mrb[16].mxu0 %v1631_v33  ;;  %1017 = vmatmul.mubr.bf16.gmra.mrb[16].mxu1 %v1632_v34 }
  0x50   : > { %1518 = vmatprep.mubr.msk.bf16.mxu0 %vm651_vm0, %v1633_v35  ;;  %1544 = vmatprep.mubr.msk.bf16.mxu1 %vm651_vm0, %v1635_v36 }
  0x51   : > { %1177 = vmatpush1.bf16.msra.mxu1 %v1835_v13  ;;  %1124 = vmatpush1.bf16.msra.mxu0 %v1835_v13 }
  0x52   : > { %1178 = vmatprep.subr.bf16.mxu1 %v1679_v1  ;;  %1125 = vmatprep.subr.bf16.mxu0 %v1679_v1  ;;  %v1958_v1 = vld [vmem:[%s2101_s6] ss:$0 sm:$0xff] }
  0x55   : > { %1179 = vmatpush1.bf16.msra.mxu1 %v1844_v16  ;;  %1126 = vmatpush1.bf16.msra.mxu0 %v1844_v16 }
  0x57   : > { %756 = vmatmul.mubr.bf16.gmra.mrb[20].mxu0 %v1637_v37  ;;  %1025 = vmatmul.mubr.bf16.gmra.mrb[20].mxu1 %v1638_v38 }
  0x58   : > { %1519 = vmatprep.mubr.msk.bf16.mxu0 %vm651_vm0, %v1639_v39  ;;  %1545 = vmatprep.mubr.msk.bf16.mxu1 %vm651_vm0, %v1641_v40 }
  0x5f   : > { %764 = vmatmul.mubr.bf16.gmra.mrb[24].mxu0 %v1643_v41  ;;  %1033 = vmatmul.mubr.bf16.gmra.mrb[24].mxu1 %v1644_v42 }
  0x60   : > { %1520 = vmatprep.mubr.msk.bf16.mxu0 %vm651_vm0, %v1645_v43  ;;  %1546 = vmatprep.mubr.msk.bf16.mxu1 %vm651_vm0, %v1647_v44 }
  0x67   : > { %772 = vmatmul.mubr.bf16.gmra.mrb[28].mxu0 %v1649_v47  ;;  %1041 = vmatmul.mubr.bf16.gmra.mrb[28].mxu1 %v1650_v48 }
  0x68   : > { %1549 = vmatprep.mubr.msk.bf16.mxu0 %vm651_vm0, %v1548_v49  ;;  %1552 = vmatprep.mubr.msk.bf16.mxu1 %vm651_vm0, %v1551_v50 }
  0x6f   : > { %1140 = vmatmul.mubr.bf16.vlgmr.msra.gmra.mrb[32].mxu0 %v1547_v51  ;;  %1193 = vmatmul.mubr.bf16.vlgmr.msra.gmra.mrb[32].mxu1 %v1550_v52 }
 0x102   : > { %v1944_v53 = vpop.f32.mrb[0].mxu0  ;;  %v1946_v54 = vpop.f32.mrb[0].mxu1 }
 0x103   : > { %v719_v55 = vpop.f32.mrb[1].mxu0  ;;  %v988_v56 = vpop.f32.mrb[1].mxu1 }
 0x104   : > { %v720_v57 = vpop.f32.mrb[2].mxu0  ;;  %v989_v58 = vpop.f32.mrb[2].mxu1 }
 0x105   : > { %v722_v60 = vpop.f32.mrb[3].mxu0  ;;  %v991_v61 = vpop.f32.mrb[3].mxu1  ;;  %v787_v62 = vmul.f32 %v1951_v59, %v720_v57  ;;  %v1050_v63 = vmul.f32 %v1951_v59, %v989_v58 }
 0x107   : > { %v1961_v2 = vadd.f32 %v1958_v1, %v787_v62  ;;  %v1964_v3 = vadd.f32 %v1958_v1, %v1050_v63 }
 0x109   : > { %v825_v19 = vmax.f32 %v1961_v2, 0.0  ;;  %v1082_v20 = vmax.f32 %v1964_v3, 0.0 }
 0x10a   : > { %v725_v4 = vpop.f32.mrb[4].mxu0  ;;  %v994_v5 = vpop.f32.mrb[4].mxu1 }
 0x10b   : > { %v788_v6 = vmul.f32 %v1951_v59, %v725_v4  ;;  %v1051_v7 = vmul.f32 %v1951_v59, %v994_v5  ;;  %v727_v8 = vpop.f32.mrb[5].mxu0  ;;  %v996_v9 = vpop.f32.mrb[5].mxu1 }
 0x10c   : > { %v728_v10 = vpop.f32.mrb[6].mxu0  ;;  %v997_v11 = vpop.f32.mrb[6].mxu1 }
 0x10d   : > { %v810_v13 = vadd.f32 %v1958_v1, %v788_v6  ;;  %v1067_v14 = vadd.f32 %v1958_v1, %v1051_v7  ;;  %v789_v15 = vmul.f32 %v1951_v59, %v728_v10  ;;  %v1052_v16 = vmul.f32 %v1951_v59, %v997_v11  ;;  %v730_v17 = vpop.f32.mrb[7].mxu0  ;;  %v999_v18 = vpop.f32.mrb[7].mxu1 }
 0x10f   : > { %v826_v21 = vmax.f32 %v810_v13, 0.0  ;;  %v1083_v22 = vmax.f32 %v1067_v14, 0.0  ;;  %v811_v23 = vadd.f32 %v1958_v1, %v789_v15  ;;  %v1068_v24 = vadd.f32 %v1958_v1, %v1052_v16 }
 0x111   : > { %v1221_v26 = vmax.f32 %v825_v19, %v826_v21  ;;  %v1223_v27 = vmax.f32 %v1082_v20, %v1083_v22  ;;  %v827_v28 = vmax.f32 %v811_v23, 0.0  ;;  %v1084_v29 = vmax.f32 %v1068_v24, 0.0 }
 0x112   : > { %v733_v30 = vpop.f32.mrb[8].mxu0  ;;  %v1002_v31 = vpop.f32.mrb[8].mxu1 }
 0x113   : > { %v1222_v32 = vmax.f32 %v1221_v26, %v827_v28  ;;  %v1224_v33 = vmax.f32 %v1223_v27, %v1084_v29  ;;  %v790_v34 = vmul.f32 %v1951_v59, %v733_v30  ;;  %v1053_v35 = vmul.f32 %v1951_v59, %v1002_v31  ;;  %v735_v36 = vpop.f32.mrb[9].mxu0  ;;  %v1004_v37 = vpop.f32.mrb[9].mxu1 }
 0x114   : > { %v736_v38 = vpop.f32.mrb[10].mxu0  ;;  %v1005_v39 = vpop.f32.mrb[10].mxu1 }
 0x115   : > { %v1225_v40 = vmax.f32 %v1222_v32, %v1224_v33  ;;  %v1226_v41 = vrot.slane %v1224_v33, 7  ;;  %v1230_v42 = vrot.slane %v1224_v33, %v1979_v25  ;;  %v812_v43 = vadd.f32 %v1958_v1, %v790_v34  ;;  %v738_v44 = vpop.f32.mrb[11].mxu0  ;;  %v1007_v45 = vpop.f32.mrb[11].mxu1 }
 0x116   : > { %v1069_v46 = vadd.f32 %v1958_v1, %v1053_v35  ;;  %v791_v47 = vmul.f32 %v1951_v59, %v736_v38  ;;  %v1054_v48 = vmul.f32 %v1951_v59, %v1005_v39 }
 0x117   : > { %v1231_v49 = vsel %vm1205_vm3, %v1230_v42, %v1226_v41  ;;  %v828_v50 = vmax.f32 %v812_v43, 0.0 }
 0x118   : > { %v1232_v51 = vmax.f32 %v1225_v40, %v1231_v49  ;;  %v1085_v52 = vmax.f32 %v1069_v46, 0.0  ;;  %v813_v55 = vadd.f32 %v1958_v1, %v791_v47  ;;  %v1070_v56 = vadd.f32 %v1958_v1, %v1054_v48 }
 0x119   : > { %v1235_v57 = vmax.f32 %v827_v28, %v828_v50 }
 0x11a   : > { %1553 = vst [vmem:[%s1997_s29 + $0x8] sm:$0xff] %v1232_v51  ;;  %v1237_v58 = vmax.f32 %v1084_v29, %v1085_v52  ;;  %v829_v60 = vmax.f32 %v813_v55, 0.0  ;;  %v1086_v61 = vmax.f32 %v1070_v56, 0.0  ;;  %v741_v62 = vpop.f32.mrb[12].mxu0  ;;  %v1010_v63 = vpop.f32.mrb[12].mxu1 }
 0x11b   : > { %v792_v0 = vmul.f32 %v1951_v59, %v741_v62  ;;  %v1055_v4 = vmul.f32 %v1951_v59, %v1010_v63  ;;  %v743_v5 = vpop.f32.mrb[13].mxu0  ;;  %v1012_v6 = vpop.f32.mrb[13].mxu1 }
 0x11c   : > { %v1236_v7 = vmax.f32 %v1235_v57, %v829_v60  ;;  %v1238_v8 = vmax.f32 %v1237_v58, %v1086_v61  ;;  %v744_v9 = vpop.f32.mrb[14].mxu0  ;;  %v1013_v10 = vpop.f32.mrb[14].mxu1 }
 0x11d   : > { %v814_v11 = vadd.f32 %v1958_v1, %v792_v0  ;;  %v1071_v13 = vadd.f32 %v1958_v1, %v1055_v4  ;;  %v793_v14 = vmul.f32 %v1951_v59, %v744_v9  ;;  %v1056_v15 = vmul.f32 %v1951_v59, %v1013_v10  ;;  %v746_v16 = vpop.f32.mrb[15].mxu0  ;;  %v1015_v17 = vpop.f32.mrb[15].mxu1 }
 0x11e   : > { %v1239_v18 = vmax.f32 %v1236_v7, %v1238_v8  ;;  %v1240_v21 = vrot.slane %v1238_v8, 7  ;;  %v1244_v22 = vrot.slane %v1238_v8, %v1979_v25 }
 0x11f   : > { %v830_v23 = vmax.f32 %v814_v11, 0.0  ;;  %v1087_v24 = vmax.f32 %v1071_v13, 0.0  ;;  %v815_v26 = vadd.f32 %v1958_v1, %v793_v14  ;;  %v1072_v27 = vadd.f32 %v1958_v1, %v1056_v15 }
 0x120   : > { %v1245_v28 = vsel %vm1205_vm3, %v1244_v22, %v1240_v21 }
 0x121   : > { %v1246_v29 = vmax.f32 %v1239_v18, %v1245_v28  ;;  %v1249_v30 = vmax.f32 %v829_v60, %v830_v23  ;;  %v1251_v31 = vmax.f32 %v1086_v61, %v1087_v24  ;;  %v831_v32 = vmax.f32 %v815_v26, 0.0 }
 0x122   : > { %v1088_v33 = vmax.f32 %v1072_v27, 0.0  ;;  %v749_v34 = vpop.f32.mrb[16].mxu0  ;;  %v1018_v35 = vpop.f32.mrb[16].mxu1 }
 0x123   : > { %1554 = vst [vmem:[%s1997_s29 + $0x10] sm:$0xff] %v1246_v29  ;;  %v1250_v36 = vmax.f32 %v1249_v30, %v831_v32  ;;  %v794_v37 = vmul.f32 %v1951_v59, %v749_v34  ;;  %v1057_v38 = vmul.f32 %v1951_v59, %v1018_v35  ;;  %v751_v39 = vpop.f32.mrb[17].mxu0  ;;  %v1020_v40 = vpop.f32.mrb[17].mxu1 }
 0x124   : > { %v1252_v41 = vmax.f32 %v1251_v31, %v1088_v33  ;;  %v752_v42 = vpop.f32.mrb[18].mxu0  ;;  %v1021_v43 = vpop.f32.mrb[18].mxu1 }
 0x125   : > { %v816_v44 = vadd.f32 %v1958_v1, %v794_v37  ;;  %v1073_v45 = vadd.f32 %v1958_v1, %v1057_v38  ;;  %v795_v46 = vmul.f32 %v1951_v59, %v752_v42  ;;  %v1058_v47 = vmul.f32 %v1951_v59, %v1021_v43  ;;  %v754_v48 = vpop.f32.mrb[19].mxu0  ;;  %v1023_v49 = vpop.f32.mrb[19].mxu1 }
 0x126   : > { %v1253_v50 = vmax.f32 %v1250_v36, %v1252_v41  ;;  %v1254_v51 = vrot.slane %v1252_v41, 7  ;;  %v1258_v52 = vrot.slane %v1252_v41, %v1979_v25 }
 0x127   : > { %v832_v55 = vmax.f32 %v816_v44, 0.0  ;;  %v1089_v56 = vmax.f32 %v1073_v45, 0.0  ;;  %v817_v57 = vadd.f32 %v1958_v1, %v795_v46  ;;  %v1074_v58 = vadd.f32 %v1958_v1, %v1058_v47 }
 0x128   : > { %v1259_v60 = vsel %vm1205_vm3, %v1258_v52, %v1254_v51 }
 0x129   : > { %v1260_v61 = vmax.f32 %v1253_v50, %v1259_v60  ;;  %v1263_v62 = vmax.f32 %v831_v32, %v832_v55  ;;  %v1265_v63 = vmax.f32 %v1088_v33, %v1089_v56  ;;  %v833_v0 = vmax.f32 %v817_v57, 0.0 }
 0x12a   : > { %v1090_v4 = vmax.f32 %v1074_v58, 0.0  ;;  %v757_v5 = vpop.f32.mrb[20].mxu0  ;;  %v1026_v6 = vpop.f32.mrb[20].mxu1 }
 0x12b   : > { %1555 = vst [vmem:[%s1997_s29 + $0x18] sm:$0xff] %v1260_v61  ;;  %v1264_v7 = vmax.f32 %v1263_v62, %v833_v0  ;;  %v796_v8 = vmul.f32 %v1951_v59, %v757_v5  ;;  %v1059_v9 = vmul.f32 %v1951_v59, %v1026_v6  ;;  %v759_v10 = vpop.f32.mrb[21].mxu0  ;;  %v1028_v11 = vpop.f32.mrb[21].mxu1 }
 0x12c   : > { %v1266_v13 = vmax.f32 %v1265_v63, %v1090_v4  ;;  %v760_v14 = vpop.f32.mrb[22].mxu0  ;;  %v1029_v15 = vpop.f32.mrb[22].mxu1 }
 0x12d   : > { %v818_v16 = vadd.f32 %v1958_v1, %v796_v8  ;;  %v1075_v17 = vadd.f32 %v1958_v1, %v1059_v9  ;;  %v797_v18 = vmul.f32 %v1951_v59, %v760_v14  ;;  %v1060_v21 = vmul.f32 %v1951_v59, %v1029_v15  ;;  %v762_v22 = vpop.f32.mrb[23].mxu0  ;;  %v1031_v23 = vpop.f32.mrb[23].mxu1 }
 0x12e   : > { %v1267_v24 = vmax.f32 %v1264_v7, %v1266_v13  ;;  %v1268_v26 = vrot.slane %v1266_v13, 7  ;;  %v1272_v27 = vrot.slane %v1266_v13, %v1979_v25 }
 0x12f   : > { %v834_v28 = vmax.f32 %v818_v16, 0.0  ;;  %v1091_v29 = vmax.f32 %v1075_v17, 0.0  ;;  %v819_v30 = vadd.f32 %v1958_v1, %v797_v18  ;;  %v1076_v31 = vadd.f32 %v1958_v1, %v1060_v21 }
 0x130   : > { %v1273_v32 = vsel %vm1205_vm3, %v1272_v27, %v1268_v26  ;;  %v786_v17 = vmul.f32 %v1951_v59, %v1944_v53 }
 0x131   : > { %v1274_v33 = vmax.f32 %v1267_v24, %v1273_v32  ;;  %v1277_v34 = vmax.f32 %v833_v0, %v834_v28  ;;  %v1279_v35 = vmax.f32 %v1090_v4, %v1091_v29  ;;  %v835_v36 = vmax.f32 %v819_v30, 0.0 }
 0x132   : > { %v1092_v37 = vmax.f32 %v1076_v31, 0.0  ;;  %v765_v38 = vpop.f32.mrb[24].mxu0  ;;  %v1034_v39 = vpop.f32.mrb[24].mxu1  ;;  %v1049_v30 = vmul.f32 %v1951_v59, %v1946_v54  ;;  %v808_v54 = vadd.f32 %v1958_v1, %v786_v17 }
 0x133   : > { %1556 = vst [vmem:[%s1997_s29 + $0x20] sm:$0xff] %v1274_v33  ;;  %v1278_v40 = vmax.f32 %v1277_v34, %v835_v36  ;;  %v798_v41 = vmul.f32 %v1951_v59, %v765_v38  ;;  %v1061_v42 = vmul.f32 %v1951_v59, %v1034_v39  ;;  %v767_v43 = vpop.f32.mrb[25].mxu0  ;;  %v1036_v44 = vpop.f32.mrb[25].mxu1 }
 0x134   : > { %v1280_v45 = vmax.f32 %v1279_v35, %v1092_v37  ;;  %v768_v46 = vpop.f32.mrb[26].mxu0  ;;  %v1037_v47 = vpop.f32.mrb[26].mxu1 }
 0x135   : > { %v820_v48 = vadd.f32 %v1958_v1, %v798_v41  ;;  %v1077_v49 = vadd.f32 %v1958_v1, %v1061_v42  ;;  %v799_v50 = vmul.f32 %v1951_v59, %v768_v46  ;;  %v1062_v51 = vmul.f32 %v1951_v59, %v1037_v47  ;;  %v770_v52 = vpop.f32.mrb[27].mxu0  ;;  %v1039_v55 = vpop.f32.mrb[27].mxu1 }
 0x136   : > { %v1281_v56 = vmax.f32 %v1278_v40, %v1280_v45  ;;  %v1282_v57 = vrot.slane %v1280_v45, 7  ;;  %v1286_v58 = vrot.slane %v1280_v45, %v1979_v25  ;;  %v1065_v45 = vadd.f32 %v1958_v1, %v1049_v30 }
 0x137   : > { %v836_v60 = vmax.f32 %v820_v48, 0.0  ;;  %v1093_v61 = vmax.f32 %v1077_v49, 0.0  ;;  %v821_v62 = vadd.f32 %v1958_v1, %v799_v50  ;;  %v1078_v63 = vadd.f32 %v1958_v1, %v1062_v51 }
 0x138   : > { %v1287_v0 = vsel %vm1205_vm3, %v1286_v58, %v1282_v57 }
 0x139   : > { %v1288_v4 = vmax.f32 %v1281_v56, %v1287_v0  ;;  %v1291_v5 = vmax.f32 %v835_v36, %v836_v60  ;;  %v1293_v6 = vmax.f32 %v1092_v37, %v1093_v61  ;;  %v837_v7 = vmax.f32 %v821_v62, 0.0 }
 0x13a   : > { %v1094_v8 = vmax.f32 %v1078_v63, 0.0  ;;  %v773_v9 = vpop.f32.mrb[28].mxu0  ;;  %v1042_v10 = vpop.f32.mrb[28].mxu1  ;;  %v824_v0 = vmax.f32 %v808_v54, 0.0 }
 0x13b   : > { %1557 = vst [vmem:[%s1997_s29 + $0x28] sm:$0xff] %v1288_v4  ;;  %v1292_v11 = vmax.f32 %v1291_v5, %v837_v7  ;;  %v800_v13 = vmul.f32 %v1951_v59, %v773_v9  ;;  %v1063_v14 = vmul.f32 %v1951_v59, %v1042_v10  ;;  %v775_v15 = vpop.f32.mrb[29].mxu0  ;;  %v1044_v16 = vpop.f32.mrb[29].mxu1  ;;  %v1081_v4 = vmax.f32 %v1065_v45, 0.0 }
 0x13c   : > { %v1294_v18 = vmax.f32 %v1293_v6, %v1094_v8  ;;  %v776_v21 = vpop.f32.mrb[30].mxu0  ;;  %v1045_v22 = vpop.f32.mrb[30].mxu1 }
 0x13d   : > { %v822_v23 = vadd.f32 %v1958_v1, %v800_v13  ;;  %v1079_v24 = vadd.f32 %v1958_v1, %v1063_v14  ;;  %v801_v26 = vmul.f32 %v1951_v59, %v776_v21  ;;  %v1064_v27 = vmul.f32 %v1951_v59, %v1045_v22  ;;  %v778_v28 = vpop.f32.mrb[31].mxu0  ;;  %v1047_v29 = vpop.f32.mrb[31].mxu1 }
 0x13e   : > { %v1295_v31 = vmax.f32 %v1292_v11, %v1294_v18  ;;  %v1296_v32 = vrot.slane %v1294_v18, 7  ;;  %v1300_v53 = vrot.slane %v1294_v18, %v1979_v25 }
 0x13f   : > { %v838_v33 = vmax.f32 %v822_v23, 0.0  ;;  %v1095_v34 = vmax.f32 %v1079_v24, 0.0  ;;  %v823_v35 = vadd.f32 %v1958_v1, %v801_v26  ;;  %v1080_v36 = vadd.f32 %v1958_v1, %v1064_v27 }
 0x140   : > { %v1301_v37 = vsel %vm1205_vm3, %v1300_v53, %v1296_v32 }
 0x141   : > { %v1302_v38 = vmax.f32 %v1295_v31, %v1301_v37  ;;  %v1305_v39 = vmax.f32 %v837_v7, %v838_v33  ;;  %v1307_v40 = vmax.f32 %v1094_v8, %v1095_v34  ;;  %v839_v41 = vmax.f32 %v823_v35, 0.0 }
 0x142   : > { %v1096_v42 = vmax.f32 %v1080_v36, 0.0  ;;  %v1141_v43 = vpop.f32.mrb[32].mxu0  ;;  %v1194_v44 = vpop.f32.mrb[32].mxu1 }
 0x143   : > { %1558 = vst [vmem:[%s1997_s29 + $0x30] sm:$0xff] %v1302_v38  ;;  %v1306_v46 = vmax.f32 %v1305_v39, %v839_v41  ;;  %v1147_v47 = vmul.f32 %v1951_v59, %v1141_v43  ;;  %v1200_v48 = vmul.f32 %v1951_v59, %v1194_v44  ;;  %v1143_v49 = vpop.f32.mrb[33].mxu0  ;;  %v1196_v50 = vpop.f32.mrb[33].mxu1 }
 0x144   : > { %v1308_v51 = vmax.f32 %v1307_v40, %v1096_v42  ;;  %v1144_v52 = vpop.f32.mrb[34].mxu0  ;;  %v1197_v55 = vpop.f32.mrb[34].mxu1 }
 0x145   : > { %v1148_v56 = vadd.f32 %v1958_v1, %v1147_v47  ;;  %v1201_v57 = vadd.f32 %v1958_v1, %v1200_v48  ;;  %v1145_v58 = vpop.f32.mrb[35].mxu0  ;;  %v1198_v60 = vpop.f32.mrb[35].mxu1 }
 0x146   : > { %v1309_v61 = vmax.f32 %v1306_v46, %v1308_v51  ;;  %v1310_v62 = vrot.slane %v1308_v51, 7  ;;  %v1314_v63 = vrot.slane %v1308_v51, %v1979_v25 }
 0x147   : > { %v1149_v59 = vmax.f32 %v1148_v56, 0.0  ;;  %v1202_v5 = vmax.f32 %v1201_v57, 0.0 }
 0x148   : > { %v1315_v6 = vsel %vm1205_vm3, %v1314_v63, %v1310_v62 }
 0x149   : > { %v1316_v7 = vmax.f32 %v1309_v61, %v1315_v6  ;;  %v1206_v8 = vmax.f32 %v1149_v59, %v824_v0  ;;  %v1208_v9 = vmax.f32 %v1202_v5, %v1081_v4 }
 0x14b   : > { %1559 = vst [vmem:[%s1997_s29 + $0x38] sm:$0xff] %v1316_v7  ;;  %v1207_v1 = vmax.f32 %v1206_v8, %v825_v19  ;;  %v1209_v10 = vmax.f32 %v1208_v9, %v1082_v20 }
 0x14d   : > { %v1210_v11 = vmax.f32 %v1207_v1, %v1209_v10  ;;  %v1211_v13 = vrot.slane %v1209_v10, 7  ;;  %v1217_v14 = vrot.slane %v1209_v10, %v1979_v25 }
 0x14f   : > { %v1218_v15 = vsel %vm1205_vm3, %v1217_v14, %v1211_v13 }
 0x150   : > { %v1219_v16 = vmax.f32 %v1210_v11, %v1218_v15 }
 0x152   : > { %1220 = vst [vmem:[%s1997_s29] sm:$0xff] %v1219_v16 }
 0x153 PF: > { %s17_s26 = sadd.s32 1, %s1677_s26   ;;  %s2103_s24 = smov %s1673_s25 }
 0x154   : > { %p14_p5 = scmp.ge.s32.totalorder %s17_s26, 4   ;;  %s2104_s25 = smov %s2106_s27 }
 0x156   :  { %16 = sbr.rel (!%p14_p5) target bundleno = 2 (0x2), region = 94 }

</bundles_post_ra>
